<compile_context>
chip_gen: v6e
topology: v6e:2x2x1
jax: 0.10.0
libtpu: 0.0.40
codegen_flags: <defaults>
</compile_context>

<pallas_src>
import jax
import jax.numpy as jnp
from jax.experimental import pallas as pl
from jax.experimental.pallas import tpu as pltpu

X_DIM, H1, H2, Z_DIM = 32, 64, 32, 16
NP = 128                      # lane padding for the packed weight slab
OUT_DIM = X_DIM + 2 * Z_DIM   # 64: (x_hat | mu | log_var)

# row offsets of each (zero-padded) weight block inside the packed slab
_W_OFFS = {1: 0 * NP, 2: 1 * NP, 3: 2 * NP, 4: 3 * NP, 5: 4 * NP, 6: 5 * NP}
_W_ROWS = 6 * NP


def _round_up(n, m):
    return ((n + m - 1) // m) * m


def _vae_kernel(x_ref, eps_ref, w_ref, b_ref, out_ref):
    """x_ref: (TM, 32)  eps_ref: (TM, 16)  w_ref: (768, 128)  b_ref: (8, 128)
    out_ref: (TM, 64) = (x_hat | mu | log_var)."""
    f32 = jnp.float32
    relu = lambda v: jnp.maximum(v, 0.0)

    x = x_ref[...]          # (TM, 32)
    eps = eps_ref[...]      # (TM, 16)

    # ---- encoder (all activations carried as zero-padded 128-lane tiles) ----
    # fc1: (TM,32) @ (32,128) -> (TM,128); cols >= 64 stay exactly 0.
    h = relu(jnp.dot(x, w_ref[_W_OFFS[1]:_W_OFFS[1] + X_DIM, :],
                     preferred_element_type=f32) + b_ref[0:1, :])
    # fc2: zero rows/cols of the padded weight keep padding lanes at 0.
    h = relu(jnp.dot(h, w_ref[_W_OFFS[2]:_W_OFFS[2] + NP, :],
                     preferred_element_type=f32) + b_ref[1:2, :])
    # fused fc31|fc32: one matmul, cols 0:16 = mu, 16:32 = log_var.
    mulv = jnp.dot(h, w_ref[_W_OFFS[3]:_W_OFFS[3] + NP, :],
                   preferred_element_type=f32) + b_ref[2:3, :]

    # ---- sampling (reparameterization): z = eps * exp(0.5*log_var) + mu ----
    mu = mulv[:, 0:Z_DIM]
    log_var = mulv[:, Z_DIM:2 * Z_DIM]
    z = eps * jnp.exp(0.5 * log_var) + mu          # (TM, 16)

    # ---- decoder ----
    d = relu(jnp.dot(z, w_ref[_W_OFFS[4]:_W_OFFS[4] + Z_DIM, :],
                     preferred_element_type=f32) + b_ref[3:4, :])
    d = relu(jnp.dot(d, w_ref[_W_OFFS[5]:_W_OFFS[5] + NP, :],
                     preferred_element_type=f32) + b_ref[4:5, :])
    d = relu(jnp.dot(d, w_ref[_W_OFFS[6]:_W_OFFS[6] + NP, :],
                     preferred_element_type=f32) + b_ref[5:6, :])

    # single lane-contiguous output slab: (x_hat | mu | log_var)
    out_ref[...] = jnp.concatenate([d[:, 0:X_DIM], mulv[:, 0:2 * Z_DIM]], axis=-1)


def pack_params(p):
    """Pack 7 (w, b) pairs (fc31/fc32 fused) into two 128-lane VMEM slabs.

    w_slab: (6*128, 128) f32 — weight i occupies rows [i*128, i*128+din),
            cols [0, dout); everything else is exactly zero so padded lanes of
            the activations never contribute.
    b_slab: (8, 128) f32 — row i holds bias i (zero padded).
    Do this once per parameter set, not per forward call.
    """
    w3 = jnp.concatenate([p["w31"], p["w32"]], axis=1)        # (H2, 2*Z)
    b3 = jnp.concatenate([p["b31"], p["b32"]], axis=1)        # (1, 2*Z)
    weights = [p["w1"], p["w2"], w3, p["w4"], p["w5"], p["w6"]]
    biases = [p["b1"], p["b2"], b3, p["b4"], p["b5"], p["b6"]]

    w_slab = jnp.zeros((_W_ROWS, NP), jnp.float32)
    for i, w in enumerate(weights):
        din, dout = w.shape
        w_slab = w_slab.at[i * NP:i * NP + din, :dout].set(w.astype(jnp.float32))

    b_slab = jnp.zeros((8, NP), jnp.float32)
    for i, b in enumerate(biases):
        b_slab = b_slab.at[i, :b.shape[-1]].set(b.reshape(-1).astype(jnp.float32))
    return w_slab, b_slab


def vae_forward(x, eps, packed):
    """x: [...] flattened to (-1, 32); eps: [B, Z_DIM]; packed = pack_params(params)."""
    w_slab, b_slab = packed
    x2d = x.reshape(-1, X_DIM).astype(jnp.float32)
    B = x2d.shape[0]

    # batch tile: multiple of 8 sublanes; large B -> pipelined / core-parallel grid
    TM = min(512, _round_up(max(B, 1), 8))
    B_pad = _round_up(B, TM)
    n_tiles = B_pad // TM
    if B_pad != B:
        x2d = jnp.pad(x2d, ((0, B_pad - B), (0, 0)))
        eps_p = jnp.pad(eps.astype(jnp.float32), ((0, B_pad - B), (0, 0)))
    else:
        eps_p = eps.astype(jnp.float32)

    out = pl.pallas_call(
        _vae_kernel,
        out_shape=jax.ShapeDtypeStruct((B_pad, OUT_DIM), jnp.float32),
        grid=(n_tiles,),
        in_specs=[
            pl.BlockSpec((TM, X_DIM), lambda i: (i, 0)),      # x tile
            pl.BlockSpec((TM, Z_DIM), lambda i: (i, 0)),      # eps tile
            pl.BlockSpec((_W_ROWS, NP), lambda i: (0, 0)),    # weights: VMEM-resident
            pl.BlockSpec((8, NP), lambda i: (0, 0)),          # biases: VMEM-resident
        ],
        out_specs=pl.BlockSpec((TM, OUT_DIM), lambda i: (i, 0)),
        compiler_params=pltpu.CompilerParams(
            dimension_semantics=("parallel",)),               # v7x: 2 TCs split batch
    )(x2d, eps_p, w_slab, b_slab)

    x_hat = out[:B, 0:X_DIM]
    mu = out[:B, X_DIM:X_DIM + Z_DIM]
    log_var = out[:B, X_DIM + Z_DIM:X_DIM + 2 * Z_DIM]
    return x_hat, mu, log_var


def init_params(key):
    """Deterministic synthetic parameter init (shapes match the nn.Linear layers,
    stored transposed as [in, out])."""
    dims = {
        "1": (X_DIM, H1), "2": (H1, H2), "31": (H2, Z_DIM), "32": (H2, Z_DIM),
        "4": (Z_DIM, H2), "5": (H2, H1), "6": (H1, X_DIM),
    }
    params = {}
    for name, (din, dout) in dims.items():
        key, kw, kb = jax.random.split(key, 3)
        scale = 1.0 / jnp.sqrt(jnp.float32(din))
        params[f"w{name}"] = jax.random.uniform(
            kw, (din, dout), jnp.float32, -scale, scale)
        params[f"b{name}"] = jax.random.uniform(
            kb, (1, dout), jnp.float32, -scale, scale)
    return params


def vae_forward_ref(x, eps, p):
    """Plain-JAX reference for correctness checking (mirrors the PyTorch forward)."""
    x2d = x.reshape(-1, X_DIM).astype(jnp.float32)
    relu = lambda v: jnp.maximum(v, 0.0)
    h = relu(x2d @ p["w1"] + p["b1"])
    h = relu(h @ p["w2"] + p["b2"])
    mu = h @ p["w31"] + p["b31"]
    log_var = h @ p["w32"] + p["b32"]
    z = eps * jnp.exp(0.5 * log_var) + mu
    d = relu(z @ p["w4"] + p["b4"])
    d = relu(d @ p["w5"] + p["b5"])
    d = relu(d @ p["w6"] + p["b6"])
    return d, mu, log_var


if __name__ == "__main__":
    key = jax.random.PRNGKey(0)
    kx, keps, kp = jax.random.split(key, 3)

    # small input consistent with forward(): x.view(-1, 32) -> batch of 2
    x = jax.random.normal(kx, (2, 4, 8), jnp.float32)
    B = x.size // X_DIM
    # eps is the randn_like noise from sampling(); passed in for determinism
    eps = jax.random.normal(keps, (B, Z_DIM), jnp.float32)

    params = init_params(kp)
    packed = pack_params(params)   # one-time packing into two VMEM slabs

    x_hat, mu, log_var = jax.block_until_ready(vae_forward(x, eps, packed))
    x_hat_r, mu_r, log_var_r = vae_forward_ref(x, eps, params)

    assert x_hat.shape == (B, X_DIM) and mu.shape == (B, Z_DIM) and log_var.shape == (B, Z_DIM)
    assert jnp.allclose(x_hat, x_hat_r, atol=1e-5, rtol=1e-5)
    assert jnp.allclose(mu, mu_r, atol=1e-5, rtol=1e-5)
    assert jnp.allclose(log_var, log_var_r, atol=1e-5, rtol=1e-5)

    # TODO(synk): gaussian_likelihood is a standalone loss helper (not called in
    # forward) and is left out of the kernel.
    print("KERNEL_OK")
</pallas_src>

<mosaic_0001>
module attributes {stable_mosaic.version = 11 : i64} {
  func.func @_vae_kernel(%arg0: i32, %arg1: memref<8x32xf32, #tpu.memory_space<vmem>>, %arg2: memref<8x16xf32, #tpu.memory_space<vmem>>, %arg3: memref<768x128xf32, #tpu.memory_space<vmem>>, %arg4: memref<8x128xf32, #tpu.memory_space<vmem>>, %arg5: memref<8x64xf32, #tpu.memory_space<vmem>>) attributes {dimension_semantics = [#tpu.dimension_semantics<parallel>], iteration_bounds = array<i64: 1>, scalar_prefetch = 0 : i64, scratch_operands = 0 : i64, tpu.core_type = #tpu.core_type<tc>, window_params = [{transform_indices = @transform_0, window_bounds = array<i64: 8, 32>}, {transform_indices = @transform_1, window_bounds = array<i64: 8, 16>}, {pipeline_mode = #tpu.pipeline_mode<synchronous>, transform_indices = @transform_2, window_bounds = array<i64: 768, 128>}, {pipeline_mode = #tpu.pipeline_mode<synchronous>, transform_indices = @transform_3, window_bounds = array<i64: 8, 128>}, {transform_indices = @transform_4, window_bounds = array<i64: 8, 64>}]} {
    %c0 = arith.constant 0 : index
    %c0_0 = arith.constant 0 : index
    %0 = vector.load %arg1[%c0, %c0_0] : memref<8x32xf32, #tpu.memory_space<vmem>>, vector<8x32xf32>
    %c0_1 = arith.constant 0 : index
    %c0_2 = arith.constant 0 : index
    %1 = vector.load %arg2[%c0_1, %c0_2] : memref<8x16xf32, #tpu.memory_space<vmem>>, vector<8x16xf32>
    %c0_3 = arith.constant 0 : index
    %c0_4 = arith.constant 0 : index
    %2 = vector.load %arg3[%c0_3, %c0_4] : memref<768x128xf32, #tpu.memory_space<vmem>>, vector<32x128xf32>
    %cst = arith.constant dense<0.000000e+00> : vector<8x128xf32>
    %3 = tpu.matmul %0, %2, %cst {dimension_numbers = #tpu.dot_dimension_numbers<[1], [0], [0], [1], [0, 0, 1, 1], [], []>} : vector<8x32xf32>, vector<32x128xf32>, vector<8x128xf32> -> vector<8x128xf32>
    %c0_5 = arith.constant 0 : index
    %c0_6 = arith.constant 0 : index
    %4 = vector.load %arg4[%c0_5, %c0_6] : memref<8x128xf32, #tpu.memory_space<vmem>>, vector<1x128xf32>
    %5 = vector.broadcast %4 : vector<1x128xf32> to vector<8x128xf32>
    %6 = arith.addf %3, %5 : vector<8x128xf32>
    %cst_7 = arith.constant 0.000000e+00 : f32
    %7 = vector.broadcast %cst_7 : f32 to vector<8x128xf32>
    %8 = arith.maximumf %6, %7 : vector<8x128xf32>
    %c128 = arith.constant 128 : index
    %c0_8 = arith.constant 0 : index
    %9 = vector.load %arg3[%c128, %c0_8] : memref<768x128xf32, #tpu.memory_space<vmem>>, vector<128x128xf32>
    %cst_9 = arith.constant dense<0.000000e+00> : vector<8x128xf32>
    %10 = tpu.matmul %8, %9, %cst_9 {dimension_numbers = #tpu.dot_dimension_numbers<[1], [0], [0], [1], [0, 0, 1, 1], [], []>} : vector<8x128xf32>, vector<128x128xf32>, vector<8x128xf32> -> vector<8x128xf32>
    %c1 = arith.constant 1 : index
    %c0_10 = arith.constant 0 : index
    %11 = vector.load %arg4[%c1, %c0_10] : memref<8x128xf32, #tpu.memory_space<vmem>>, vector<1x128xf32>
    %12 = vector.broadcast %11 : vector<1x128xf32> to vector<8x128xf32>
    %13 = arith.addf %10, %12 : vector<8x128xf32>
    %cst_11 = arith.constant 0.000000e+00 : f32
    %14 = vector.broadcast %cst_11 : f32 to vector<8x128xf32>
    %15 = arith.maximumf %13, %14 : vector<8x128xf32>
    %c256 = arith.constant 256 : index
    %c0_12 = arith.constant 0 : index
    %16 = vector.load %arg3[%c256, %c0_12] : memref<768x128xf32, #tpu.memory_space<vmem>>, vector<128x128xf32>
    %cst_13 = arith.constant dense<0.000000e+00> : vector<8x128xf32>
    %17 = tpu.matmul %15, %16, %cst_13 {dimension_numbers = #tpu.dot_dimension_numbers<[1], [0], [0], [1], [0, 0, 1, 1], [], []>} : vector<8x128xf32>, vector<128x128xf32>, vector<8x128xf32> -> vector<8x128xf32>
    %c2 = arith.constant 2 : index
    %c0_14 = arith.constant 0 : index
    %18 = vector.load %arg4[%c2, %c0_14] : memref<8x128xf32, #tpu.memory_space<vmem>>, vector<1x128xf32>
    %19 = vector.broadcast %18 : vector<1x128xf32> to vector<8x128xf32>
    %20 = arith.addf %17, %19 : vector<8x128xf32>
    %21 = vector.extract_strided_slice %20 {offsets = [0, 0], sizes = [8, 16], strides = [1, 1]} : vector<8x128xf32> to vector<8x16xf32>
    %22 = vector.extract_strided_slice %20 {offsets = [0, 16], sizes = [8, 16], strides = [1, 1]} : vector<8x128xf32> to vector<8x16xf32>
    %cst_15 = arith.constant 5.000000e-01 : f32
    %23 = vector.broadcast %cst_15 : f32 to vector<8x16xf32>
    %24 = arith.mulf %23, %22 : vector<8x16xf32>
    %25 = math.exp %24 : vector<8x16xf32>
    %26 = arith.mulf %1, %25 : vector<8x16xf32>
    %27 = arith.addf %26, %21 : vector<8x16xf32>
    %c384 = arith.constant 384 : index
    %c0_16 = arith.constant 0 : index
    %28 = vector.load %arg3[%c384, %c0_16] : memref<768x128xf32, #tpu.memory_space<vmem>>, vector<16x128xf32>
    %cst_17 = arith.constant dense<0.000000e+00> : vector<8x128xf32>
    %29 = tpu.matmul %27, %28, %cst_17 {dimension_numbers = #tpu.dot_dimension_numbers<[1], [0], [0], [1], [0, 0, 1, 1], [], []>} : vector<8x16xf32>, vector<16x128xf32>, vector<8x128xf32> -> vector<8x128xf32>
    %c3 = arith.constant 3 : index
    %c0_18 = arith.constant 0 : index
    %30 = vector.load %arg4[%c3, %c0_18] : memref<8x128xf32, #tpu.memory_space<vmem>>, vector<1x128xf32>
    %31 = vector.broadcast %30 : vector<1x128xf32> to vector<8x128xf32>
    %32 = arith.addf %29, %31 : vector<8x128xf32>
    %cst_19 = arith.constant 0.000000e+00 : f32
    %33 = vector.broadcast %cst_19 : f32 to vector<8x128xf32>
    %34 = arith.maximumf %32, %33 : vector<8x128xf32>
    %c512 = arith.constant 512 : index
    %c0_20 = arith.constant 0 : index
    %35 = vector.load %arg3[%c512, %c0_20] : memref<768x128xf32, #tpu.memory_space<vmem>>, vector<128x128xf32>
    %cst_21 = arith.constant dense<0.000000e+00> : vector<8x128xf32>
    %36 = tpu.matmul %34, %35, %cst_21 {dimension_numbers = #tpu.dot_dimension_numbers<[1], [0], [0], [1], [0, 0, 1, 1], [], []>} : vector<8x128xf32>, vector<128x128xf32>, vector<8x128xf32> -> vector<8x128xf32>
    %c4 = arith.constant 4 : index
    %c0_22 = arith.constant 0 : index
    %37 = vector.load %arg4[%c4, %c0_22] : memref<8x128xf32, #tpu.memory_space<vmem>>, vector<1x128xf32>
    %38 = vector.broadcast %37 : vector<1x128xf32> to vector<8x128xf32>
    %39 = arith.addf %36, %38 : vector<8x128xf32>
    %cst_23 = arith.constant 0.000000e+00 : f32
    %40 = vector.broadcast %cst_23 : f32 to vector<8x128xf32>
    %41 = arith.maximumf %39, %40 : vector<8x128xf32>
    %c640 = arith.constant 640 : index
    %c0_24 = arith.constant 0 : index
    %42 = vector.load %arg3[%c640, %c0_24] : memref<768x128xf32, #tpu.memory_space<vmem>>, vector<128x128xf32>
    %cst_25 = arith.constant dense<0.000000e+00> : vector<8x128xf32>
    %43 = tpu.matmul %41, %42, %cst_25 {dimension_numbers = #tpu.dot_dimension_numbers<[1], [0], [0], [1], [0, 0, 1, 1], [], []>} : vector<8x128xf32>, vector<128x128xf32>, vector<8x128xf32> -> vector<8x128xf32>
    %c5 = arith.constant 5 : index
    %c0_26 = arith.constant 0 : index
    %44 = vector.load %arg4[%c5, %c0_26] : memref<8x128xf32, #tpu.memory_space<vmem>>, vector<1x128xf32>
    %45 = vector.broadcast %44 : vector<1x128xf32> to vector<8x128xf32>
    %46 = arith.addf %43, %45 : vector<8x128xf32>
    %cst_27 = arith.constant 0.000000e+00 : f32
    %47 = vector.broadcast %cst_27 : f32 to vector<8x128xf32>
    %48 = arith.maximumf %46, %47 : vector<8x128xf32>
    %49 = vector.extract_strided_slice %48 {offsets = [0, 0], sizes = [8, 32], strides = [1, 1]} : vector<8x128xf32> to vector<8x32xf32>
    %50 = vector.extract_strided_slice %20 {offsets = [0, 0], sizes = [8, 32], strides = [1, 1]} : vector<8x128xf32> to vector<8x32xf32>
    %51 = tpu.concatenate %49, %50 in 1 : vector<8x32xf32>, vector<8x32xf32> -> vector<8x64xf32>
    %c0_28 = arith.constant 0 : index
    %c0_29 = arith.constant 0 : index
    %52 = vector.load %arg5[%c0_28, %c0_29] : memref<8x64xf32, #tpu.memory_space<vmem>>, vector<8x64xf32>
    tpu.vector_store %arg5[%c0_28, %c0_29], %51 {strides = array<i32>} : memref<8x64xf32, #tpu.memory_space<vmem>>, vector<8x64xf32>,
    return
  }
  func.func @transform_0(%arg0: i32) -> (i32, i32) {
    %c0_i32 = arith.constant 0 : i32
    %c0_i32_0 = arith.constant 0 : i32
    return %arg0, %c0_i32 : i32, i32
  }
  func.func @transform_1(%arg0: i32) -> (i32, i32) {
    %c0_i32 = arith.constant 0 : i32
    %c0_i32_0 = arith.constant 0 : i32
    return %arg0, %c0_i32 : i32, i32
  }
  func.func @transform_2(%arg0: i32) -> (i32, i32) {
    %c0_i32 = arith.constant 0 : i32
    %c0_i32_0 = arith.constant 0 : i32
    %c0_i32_1 = arith.constant 0 : i32
    return %c0_i32, %c0_i32_0 : i32, i32
  }
  func.func @transform_3(%arg0: i32) -> (i32, i32) {
    %c0_i32 = arith.constant 0 : i32
    %c0_i32_0 = arith.constant 0 : i32
    %c0_i32_1 = arith.constant 0 : i32
    return %c0_i32, %c0_i32_0 : i32, i32
  }
  func.func @transform_4(%arg0: i32) -> (i32, i32) {
    %c0_i32 = arith.constant 0 : i32
    %c0_i32_0 = arith.constant 0 : i32
    return %arg0, %c0_i32 : i32, i32
  }
}

</mosaic_0001>

<bundles_post_ra>
// kernel: tpu_custom_call.1
= control target key start
LH: loop header
LB: loop body
LE: loop exit
PB: predicated region body
PF: predicated region fallthrough
CT: control target
= control target key end

     0   :  { %9 = vsyncpa [#allocation3], 0  ;;  %s1133_s0 = inlined_call_operand.hbm [shape: f32[8,32], index: 0, kind: input, shape index: {}]   ;;  %s1134_s1 = inlined_call_operand.hbm [shape: f32[8,16], index: 1, kind: input, shape index: {}]   ;;  %s1135_s2 = inlined_call_operand.hbm [shape: f32[768,128], index: 2, kind: input, shape index: {}]   ;;  %s1136_s3 = inlined_call_operand.hbm [shape: f32[8,128], index: 3, kind: input, shape index: {}]   ;;  %s1137_s4 = inlined_call_operand.hbm [shape: f32[8,64], index: 4, kind: output, shape index: {}]  }
   0x1   :  { %10 = vsyncpa [#allocation6], 0 }
   0x2   :  { %11 = vsyncpa [#allocation9], 0 }
   0x3   :  { %12 = vsyncpa [#allocation4], 0  ;;  %s998_s15 = smov [#allocation5]   ;;  %s999_s17 = smov [#allocation2]  }
   0x4   :  { %s29_s16 = sshll.u32 %s998_s15, 4  ;;  %s19_s18 = sshll.u32 %s999_s17, 4  ;;  %s30_s16 = int_to_ptr.vmem [resolvable:$true] %s29_s16  ;;  %s20_s18 = int_to_ptr.vmem [resolvable:$true] %s19_s18 }
   0x5   :  { %s898_s19 = scalar_lea.vmem %s30_s16, 128  ;;  %p903_p1 = scmp.lt.s32.totalorder %s30_s16, %s30_s16 }
   0x6   :  { %p899_p0 = scmp.ne.s32.totalorder %s30_s16, %s898_s19  ;;  %p904_p2 = scmp.lt.s32.totalorder %s898_s19, %s898_s19 }
   0x8   :  { %p905_p3 = por %p904_p2, %p903_p1 }
   0xa   :  { %p906_p4 = pnand %p905_p3, %p899_p0 }
   0xc   :  { %909 = shalt.err (!%p906_p4)
}
   0xd   :  { %32 = dma.hbm_to_vmem [thread:$0]  %s1134_s1, 128, %s30_s16, [#allocation6]  }
   0xe   :  { %s918_s22 = scalar_lea.vmem %s20_s18, 128  ;;  %p923_p6 = scmp.lt.s32.totalorder %s20_s18, %s20_s18 }
   0xf   :  { %p919_p5 = scmp.ne.s32.totalorder %s20_s18, %s918_s22  ;;  %p924_p7 = scmp.lt.s32.totalorder %s918_s22, %s918_s22 }
  0x11   :  { %p925_p8 = por %p924_p7, %p923_p6 }
  0x13   :  { %p926_p9 = pnand %p925_p8, %p919_p5 }
  0x15   :  { %929 = shalt.err (!%p926_p9)
}
  0x16   :  { %22 = dma.hbm_to_vmem [thread:$0]  %s1133_s0, 128, %s20_s18, [#allocation3]  }
  0x17   :  { %s1000_s25 = smov [#allocation7]  }
  0x18   :  { %s38_s26 = sshll.u32 %s1000_s25, 4  ;;  %s39_s26 = int_to_ptr.vmem [resolvable:$true] %s38_s26 }
  0x19   :  { %s938_s27 = scalar_lea.vmem %s39_s26, 12288  ;;  %p943_p11 = scmp.lt.s32.totalorder %s39_s26, %s39_s26 }
  0x1a   :  { %p939_p10 = scmp.ne.s32.totalorder %s39_s26, %s938_s27  ;;  %p944_p12 = scmp.lt.s32.totalorder %s938_s27, %s938_s27 }
  0x1c   :  { %p945_p13 = por %p944_p12, %p943_p11 }
  0x1e   :  { %p946_p0 = pnand %p945_p13, %p939_p10 }
  0x20   :  { %949 = shalt.err (!%p946_p0)
}
  0x21   :  { %s1001_s1 = smov 128   ;;  %s1002_s28 = smov 8  }
  0x22   :  { %44 = dma.hbm_to_vmem [thread:$0]  %s1135_s2, 12288, %s39_s26, [#allocation6], %s1001_s1, %s1001_s1, %s1002_s28  }
  0x23   :  { %s1003_s5 = smov [#allocation8]  }
  0x24   :  { %s51_s6 = sshll.u32 %s1003_s5, 4  ;;  %s52_s6 = int_to_ptr.vmem [resolvable:$true] %s51_s6 }
  0x25   :  { %s958_s0 = scalar_lea.vmem %s52_s6, 128  ;;  %p963_p2 = scmp.lt.s32.totalorder %s52_s6, %s52_s6 }
  0x26   :  { %p959_p1 = scmp.ne.s32.totalorder %s52_s6, %s958_s0  ;;  %p964_p3 = scmp.lt.s32.totalorder %s958_s0, %s958_s0 }
  0x28   :  { %p965_p4 = por %p964_p3, %p963_p2 }
  0x2a   :  { %p966_p5 = pnand %p965_p4, %p959_p1 }
  0x2c   :  { %969 = shalt.err (!%p966_p5)
}
  0x2d   :  { %54 = dma.hbm_to_vmem [thread:$0]  %s1136_s3, 128, %s52_s6, [#allocation9]  }
  0x2e   :  { %990 = dma.done.wait [#allocation3], 128  }
  0x2f   :  { %991 = vsyncadd [#allocation3], 4294967168 }
  0x30   :  { %992 = dma.done.wait [#allocation6], 12416  }
  0x31   :  { %993 = vsyncadd [#allocation6], 4294954880 }
  0x32   :  { %994 = dma.done.wait [#allocation9], 128  }
  0x33   :  { %995 = vsyncadd [#allocation9], 4294967168  ;;  %v1004_v0 = vmov 0.0   ;;  %vm1005_vm0 = vmmov 0   ;;  %v72_v1 = vld [vmem:[#allocation7 + $0x18] sm:$0xff]  ;;  %v71_v2 = vld [vmem:[#allocation7 + $0x10] sm:$0xff] }
  0x34   :  { %719 = vmatprep.subr.mxu0 %v1004_v0  ;;  %727 = vmatprep.mubr.msk.f32.mxu0 %vm1005_vm0, %v1004_v0  ;;  %v168_v3 = vld [vmem:[#allocation7 + $0xf8] sm:$0xff]  ;;  %v70_v4 = vld [vmem:[#allocation7 + $0x8] sm:$0xff]  ;;  %v167_v5 = vld [vmem:[#allocation7 + $0xf0] sm:$0xff]  ;;  %vm78_vm1 = vcmask 261120   ;;  %s1006_s2 = smov 112   ;;  %s1007_s3 = smov 32  }
  0x35   :  { %730 = vmatprep.subr.mxu1 %v1004_v0  ;;  %762 = vmatprep.mubr.msk.f32.mxu1 %vm1005_vm0, %v1004_v0  ;;  %v166_v6 = vld [vmem:[#allocation7 + $0xe8] sm:$0xff]  ;;  %v69_v7 = vld [vmem:[#allocation7] sm:$0xff]  ;;  %v67_v8 = vld [vmem:[#allocation2] sm:$0xff]  ;;  %vm352_vm2 = vcmask 130048   ;;  %s1008_s9 = smov [#allocation10]   ;;  %vm616_vm3 = vcmask 523264  }
  0x36   :  { %720 = vmatpush3.msra.mxu0 %v72_v1  ;;  %731 = vmatpush3.msra.mxu1 %v168_v3  ;;  %v165_v9 = vld [vmem:[#allocation7 + $0xe0] sm:$0xff]  ;;  %v164_v10 = vld [vmem:[#allocation7 + $0xd8] sm:$0xff]  ;;  %v163_v11 = vld [vmem:[#allocation7 + $0xd0] sm:$0xff]  ;;  %s624_s10 = sshll.u32 %s1008_s9, 4  ;;  %s625_s10 = int_to_ptr.vmem [resolvable:$true] %s624_s10 }
  0x37   :  { %721 = vmatprep.subr.mxu0 %v1004_v0  ;;  %732 = vmatprep.subr.mxu1 %v1004_v0  ;;  %v162_v12 = vld [vmem:[#allocation7 + $0xc8] sm:$0xff]  ;;  %v161_v13 = vld [vmem:[#allocation7 + $0xc0] sm:$0xff]  ;;  %v160_v14 = vld [vmem:[#allocation7 + $0xb8] sm:$0xff]  ;;  %s970_s11 = scalar_lea.vmem %s625_s10, 128  ;;  %p975_p7 = scmp.lt.s32.totalorder %s625_s10, %s625_s10 }
  0x38   :  { %722 = vmatpush3.msra.mxu0 %v71_v2  ;;  %733 = vmatpush3.msra.mxu1 %v167_v5  ;;  %v159_v15 = vld [vmem:[#allocation7 + $0xb0] sm:$0xff]  ;;  %v158_v16 = vld [vmem:[#allocation7 + $0xa8] sm:$0xff]  ;;  %v157_v17 = vld [vmem:[#allocation7 + $0xa0] sm:$0xff]  ;;  %p971_p6 = scmp.ne.s32.totalorder %s625_s10, %s970_s11  ;;  %p976_p8 = scmp.lt.s32.totalorder %s970_s11, %s970_s11 }
  0x39   :  { %723 = vmatprep.subr.mxu0 %v1004_v0  ;;  %734 = vmatprep.subr.mxu1 %v1004_v0  ;;  %v156_v18 = vld [vmem:[#allocation7 + $0x98] sm:$0xff]  ;;  %v155_v19 = vld [vmem:[#allocation7 + $0x90] sm:$0xff]  ;;  %v154_v20 = vld [vmem:[#allocation7 + $0x88] sm:$0xff] }
  0x3a   :  { %724 = vmatpush3.msra.mxu0 %v70_v4  ;;  %735 = vmatpush3.msra.mxu1 %v166_v6  ;;  %v153_v21 = vld [vmem:[#allocation7 + $0x80] sm:$0xff]  ;;  %v260_v22 = vld [vmem:[#allocation7 + $0x178] sm:$0xff]  ;;  %v259_v23 = vld [vmem:[#allocation7 + $0x170] sm:$0xff]  ;;  %p977_p9 = por %p976_p8, %p975_p7 }
  0x3b   :  { %725 = vmatprep.subr.mxu0 %v1004_v0  ;;  %736 = vmatprep.subr.mxu1 %v1004_v0  ;;  %v258_v24 = vld [vmem:[#allocation7 + $0x168] sm:$0xff]  ;;  %v257_v25 = vld [vmem:[#allocation7 + $0x160] sm:$0xff]  ;;  %v256_v26 = vld [vmem:[#allocation7 + $0x158] sm:$0xff] }
  0x3c   :  { %726 = vmatpush3.msra.mxu0 %v69_v7  ;;  %737 = vmatpush3.msra.mxu1 %v165_v9  ;;  %v255_v27 = vld [vmem:[#allocation7 + $0x150] sm:$0xff]  ;;  %v254_v28 = vld [vmem:[#allocation7 + $0x148] sm:$0xff]  ;;  %v253_v29 = vld [vmem:[#allocation7 + $0x140] sm:$0xff]  ;;  %p978_p10 = pnand %p977_p9, %p971_p6 }
  0x3d   :  { %728 = vmatmul.mubr.msk.f32.vlgmr.msra.gmra.mxu0 %vm78_vm1, %v67_v8  ;;  %738 = vmatprep.subr.mxu1 %v1004_v0  ;;  %v252_v30 = vld [vmem:[#allocation7 + $0x138] sm:$0xff]  ;;  %v251_v31 = vld [vmem:[#allocation7 + $0x130] sm:$0xff]  ;;  %v250_v32 = vld [vmem:[#allocation7 + $0x128] sm:$0xff] }
  0x3e   :  { %765 = vmatprep.subr.mxu0 %v1004_v0  ;;  %739 = vmatpush3.msra.mxu1 %v164_v10  ;;  %v249_v33 = vld [vmem:[#allocation7 + $0x120] sm:$0xff]  ;;  %v248_v34 = vld [vmem:[#allocation7 + $0x118] sm:$0xff]  ;;  %v247_v40 = vld [vmem:[#allocation7 + $0x110] sm:$0xff] }
  0x3f   :  { %797 = vmatprep.mubr.msk.f32.mxu0 %vm1005_vm0, %v1004_v0  ;;  %740 = vmatprep.subr.mxu1 %v1004_v0  ;;  %v635_v35 = vld [vmem:[#allocation8] ss:$0 sm:$0xff]  ;;  %v246_v41 = vld [vmem:[#allocation7 + $0x108] sm:$0xff]  ;;  %v637_v43 = vld [vmem:[#allocation8 + $0x1] ss:$0 sm:$0xff] }
  0x40   :  { %741 = vmatpush3.msra.mxu1 %v163_v11  ;;  %766 = vmatpush3.msra.mxu0 %v260_v22  ;;  %v245_v42 = vld [vmem:[#allocation7 + $0x100] sm:$0xff]  ;;  %v346_v54 = vld [vmem:[#allocation7 + $0x188] sm:$0xff]  ;;  %v68_v57 = vld [vmem:[#allocation5] sm:$0xff] }
  0x41   :  { %742 = vmatprep.subr.mxu1 %v1004_v0  ;;  %767 = vmatprep.subr.mxu0 %v1004_v0  ;;  %v638_v48 = vld [vmem:[#allocation8 + $0x2] ss:$0 sm:$0xff]  ;;  %v442_v61 = vld [vmem:[#allocation7 + $0x278] sm:$0xff]  ;;  %v441_v62 = vld [vmem:[#allocation7 + $0x270] sm:$0xff] }
  0x42   :  { %743 = vmatpush3.msra.mxu1 %v162_v12  ;;  %768 = vmatpush3.msra.mxu0 %v259_v23  ;;  %v345_v55 = vld [vmem:[#allocation7 + $0x180] sm:$0xff]  ;;  %v440_v63 = vld [vmem:[#allocation7 + $0x268] sm:$0xff]  ;;  %v438_v2 = vld [vmem:[#allocation7 + $0x258] sm:$0xff] }
  0x43   :  { %744 = vmatprep.subr.mxu1 %v1004_v0  ;;  %769 = vmatprep.subr.mxu0 %v1004_v0  ;;  %v439_v1 = vld [vmem:[#allocation7 + $0x260] sm:$0xff]  ;;  %v437_v3 = vld [vmem:[#allocation7 + $0x250] sm:$0xff]  ;;  %v436_v4 = vld [vmem:[#allocation7 + $0x248] sm:$0xff] }
  0x44   :  { %745 = vmatpush3.msra.mxu1 %v161_v13  ;;  %770 = vmatpush3.msra.mxu0 %v258_v24  ;;  %v435_v5 = vld [vmem:[#allocation7 + $0x240] sm:$0xff]  ;;  %v434_v6 = vld [vmem:[#allocation7 + $0x238] sm:$0xff]  ;;  %v433_v7 = vld [vmem:[#allocation7 + $0x230] sm:$0xff] }
  0x45   :  { %746 = vmatprep.subr.mxu1 %v1004_v0  ;;  %771 = vmatprep.subr.mxu0 %v1004_v0  ;;  %v432_v8 = vld [vmem:[#allocation7 + $0x228] sm:$0xff]  ;;  %v431_v9 = vld [vmem:[#allocation7 + $0x220] sm:$0xff]  ;;  %v430_v10 = vld [vmem:[#allocation7 + $0x218] sm:$0xff] }
  0x46   :  { %747 = vmatpush3.msra.mxu1 %v160_v14  ;;  %772 = vmatpush3.msra.mxu0 %v257_v25  ;;  %v429_v11 = vld [vmem:[#allocation7 + $0x210] sm:$0xff]  ;;  %v428_v12 = vld [vmem:[#allocation7 + $0x208] sm:$0xff]  ;;  %v427_v13 = vld [vmem:[#allocation7 + $0x200] sm:$0xff] }
  0x47   :  { %748 = vmatprep.subr.mxu1 %v1004_v0  ;;  %773 = vmatprep.subr.mxu0 %v1004_v0  ;;  %v534_v14 = vld [vmem:[#allocation7 + $0x2f8] sm:$0xff]  ;;  %v525_v23 = vld [vmem:[#allocation7 + $0x2b0] sm:$0xff]  ;;  %v524_v24 = vld [vmem:[#allocation7 + $0x2a8] sm:$0xff] }
  0x48   :  { %749 = vmatpush3.msra.mxu1 %v159_v15  ;;  %774 = vmatpush3.msra.mxu0 %v256_v26  ;;  %v533_v15 = vld [vmem:[#allocation7 + $0x2f0] sm:$0xff]  ;;  %v526_v22 = vld [vmem:[#allocation7 + $0x2b8] sm:$0xff]  ;;  %v523_v25 = vld [vmem:[#allocation7 + $0x2a0] sm:$0xff] }
  0x49   :  { %750 = vmatprep.subr.mxu1 %v1004_v0  ;;  %775 = vmatprep.subr.mxu0 %v1004_v0  ;;  %v522_v26 = vld [vmem:[#allocation7 + $0x298] sm:$0xff] }
  0x4a   :  { %751 = vmatpush3.msra.mxu1 %v158_v16  ;;  %776 = vmatpush3.msra.mxu0 %v255_v27  ;;  %v532_v16 = vld [vmem:[#allocation7 + $0x2e8] sm:$0xff]  ;;  %v639_v27 = vld [vmem:[#allocation8 + $0x3] ss:$0 sm:$0xff] }
  0x4b   :  { %752 = vmatprep.subr.mxu1 %v1004_v0  ;;  %777 = vmatprep.subr.mxu0 %v1004_v0 }
  0x4c   :  { %753 = vmatpush3.msra.mxu1 %v157_v17  ;;  %778 = vmatpush3.msra.mxu0 %v254_v28  ;;  %v531_v17 = vld [vmem:[#allocation7 + $0x2e0] sm:$0xff] }
  0x4d   :  { %754 = vmatprep.subr.mxu1 %v1004_v0  ;;  %779 = vmatprep.subr.mxu0 %v1004_v0 }
  0x4e   :  { %755 = vmatpush3.msra.mxu1 %v156_v18  ;;  %780 = vmatpush3.msra.mxu0 %v253_v29  ;;  %v530_v18 = vld [vmem:[#allocation7 + $0x2d8] sm:$0xff] }
  0x4f   :  { %756 = vmatprep.subr.mxu1 %v1004_v0  ;;  %781 = vmatprep.subr.mxu0 %v1004_v0 }
  0x50   :  { %757 = vmatpush3.msra.mxu1 %v155_v19  ;;  %782 = vmatpush3.msra.mxu0 %v252_v30  ;;  %v529_v19 = vld [vmem:[#allocation7 + $0x2d0] sm:$0xff] }
  0x51   :  { %758 = vmatprep.subr.mxu1 %v1004_v0  ;;  %783 = vmatprep.subr.mxu0 %v1004_v0 }
  0x52   :  { %759 = vmatpush3.msra.mxu1 %v154_v20  ;;  %784 = vmatpush3.msra.mxu0 %v251_v31  ;;  %v528_v20 = vld [vmem:[#allocation7 + $0x2c8] sm:$0xff] }
  0x53   :  { %760 = vmatprep.subr.mxu1 %v1004_v0  ;;  %785 = vmatprep.subr.mxu0 %v1004_v0 }
  0x54   :  { %761 = vmatpush3.msra.mxu1 %v153_v21  ;;  %786 = vmatpush3.msra.mxu0 %v250_v32  ;;  %v527_v21 = vld [vmem:[#allocation7 + $0x2c0] sm:$0xff]  ;;  %v521_v32 = vld [vmem:[#allocation7 + $0x290] sm:$0xff] }
  0x55   :  { %800 = vmatprep.subr.mxu1 %v1004_v0  ;;  %787 = vmatprep.subr.mxu0 %v1004_v0 }
  0x56   :  { %788 = vmatpush3.msra.mxu0 %v249_v33  ;;  %v520_v33 = vld [vmem:[#allocation7 + $0x288] sm:$0xff] }
  0x57   :  { %789 = vmatprep.subr.mxu0 %v1004_v0 }
  0x58   :  { %790 = vmatpush3.msra.mxu0 %v248_v34  ;;  %v519_v34 = vld [vmem:[#allocation7 + $0x280] sm:$0xff] }
  0x59   :  { %791 = vmatprep.subr.mxu0 %v1004_v0 }
  0x5a   :  { %792 = vmatpush3.msra.mxu0 %v247_v40  ;;  %v642_v40 = vld [vmem:[#allocation8 + $0x5] ss:$0 sm:$0xff] }
  0x5b   :  { %793 = vmatprep.subr.mxu0 %v1004_v0 }
  0x5c   :  { %794 = vmatpush3.msra.mxu0 %v246_v41 }
  0x5d   :  { %795 = vmatprep.subr.mxu0 %v1004_v0 }
  0x5e   :  { %796 = vmatpush3.msra.mxu0 %v245_v42 }
  0x5f   :  { %842 = vmatprep.subr.mxu0 %v1004_v0 }
  0xfd   :  { %v148_v36 = vpop.f32.mrf.mxu0 }
  0xfe   :  { %v149_v37 = vadd.f32 %v635_v35, %v148_v36  ;;  %v641_v35 = vld [vmem:[#allocation8 + $0x4] ss:$0 sm:$0xff] }
  0xff   :  { %v729_v38 = vpop.f32.mrf.mxu0 }
 0x100   :  { %v152_v39 = vmax.f32 %v149_v37, 0.0 }
 0x102   :  { %763 = vmatmul.mubr.f32.vlgmr.msra.gmra.mxu1 %v152_v39 }
 0x103   :  { %804 = vmatprep.mubr.msk.f32.mxu1 %vm1005_vm0, %v1004_v0  ;;  %801 = vmatpush3.msra.mxu1 %v346_v54 }
 0x104   :  { %802 = vmatprep.subr.mxu1 %v1004_v0 }
 0x105   :  { %803 = vmatpush3.msra.mxu1 %v345_v55 }
 0x106   :  { %807 = vmatprep.subr.mxu1 %v1004_v0 }
 0x1c2   :  { %v240_v44 = vpop.f32.mrf.mxu1 }
 0x1c3   :  { %v241_v45 = vadd.f32 %v637_v43, %v240_v44 }
 0x1c4   :  { %v764_v46 = vpop.f32.mrf.mxu1 }
 0x1c5   :  { %v244_v47 = vmax.f32 %v241_v45, 0.0 }
 0x1c7   :  { %798 = vmatmul.mubr.f32.vlgmr.msra.gmra.mxu0 %v244_v47 }
 0x1c8   :  { %874 = vmatprep.mubr.msk.f32.mxu0 %vm1005_vm0, %v1004_v0  ;;  %843 = vmatpush3.msra.mxu0 %v534_v14 }
 0x1c9   :  { %844 = vmatprep.subr.mxu0 %v1004_v0 }
 0x1ca   :  { %845 = vmatpush3.msra.mxu0 %v533_v15 }
 0x1cb   :  { %846 = vmatprep.subr.mxu0 %v1004_v0 }
 0x1cc   :  { %847 = vmatpush3.msra.mxu0 %v532_v16 }
 0x1cd   :  { %848 = vmatprep.subr.mxu0 %v1004_v0 }
 0x1ce   :  { %849 = vmatpush3.msra.mxu0 %v531_v17 }
 0x1cf   :  { %850 = vmatprep.subr.mxu0 %v1004_v0 }
 0x1d0   :  { %851 = vmatpush3.msra.mxu0 %v530_v18 }
 0x1d1   :  { %852 = vmatprep.subr.mxu0 %v1004_v0 }
 0x1d2   :  { %853 = vmatpush3.msra.mxu0 %v529_v19 }
 0x1d3   :  { %854 = vmatprep.subr.mxu0 %v1004_v0 }
 0x1d4   :  { %855 = vmatpush3.msra.mxu0 %v528_v20 }
 0x1d5   :  { %856 = vmatprep.subr.mxu0 %v1004_v0 }
 0x1d6   :  { %857 = vmatpush3.msra.mxu0 %v527_v21 }
 0x1d7   :  { %858 = vmatprep.subr.mxu0 %v1004_v0 }
 0x1d8   :  { %859 = vmatpush3.msra.mxu0 %v526_v22 }
 0x1d9   :  { %860 = vmatprep.subr.mxu0 %v1004_v0 }
 0x1da   :  { %861 = vmatpush3.msra.mxu0 %v525_v23 }
 0x1db   :  { %862 = vmatprep.subr.mxu0 %v1004_v0 }
 0x1dc   :  { %863 = vmatpush3.msra.mxu0 %v524_v24 }
 0x1dd   :  { %864 = vmatprep.subr.mxu0 %v1004_v0 }
 0x1de   :  { %865 = vmatpush3.msra.mxu0 %v523_v25 }
 0x1df   :  { %866 = vmatprep.subr.mxu0 %v1004_v0 }
 0x1e0   :  { %867 = vmatpush3.msra.mxu0 %v522_v26 }
 0x1e1   :  { %868 = vmatprep.subr.mxu0 %v1004_v0 }
 0x1e2   :  { %869 = vmatpush3.msra.mxu0 %v521_v32 }
 0x1e3   :  { %870 = vmatprep.subr.mxu0 %v1004_v0 }
 0x1e4   :  { %871 = vmatpush3.msra.mxu0 %v520_v33 }
 0x1e5   :  { %872 = vmatprep.subr.mxu0 %v1004_v0 }
 0x1e6   :  { %873 = vmatpush3.msra.mxu0 %v519_v34 }
 0x287   :  { %v332_v49 = vpop.f32.mrf.mxu0 }
 0x288   :  { %v333_v50 = vadd.f32 %v638_v48, %v332_v49 }
 0x289   :  { %v799_v51 = vpop.f32.mrf.mxu0 }
 0x28a   :  { %v336_v52 = vmul.f32 0.5, %v333_v50 }
 0x28c   :  { %v337_v53 = vmul.f32 1.442695, %v336_v52 }
 0x28e   :  { %888 = vpow2.f32 %v337_v53 }
 0x29b   :  { %v889_v56 = vpop.eup %888 }
 0x29c   :  { %340 = vrot.lane.b32.xlu0 %v889_v56, %s1006_s2 }
 0x2a0   :  { %612 = vrot.lane.b32.xlu0 %v333_v50, %s1007_s3 }
 0x30e   :  { %v341_v58 = vpop.permute.xlu0 %340 }
 0x30f   :  { %v343_v59 = vmul.f32 %v341_v58, %v68_v57 }
 0x311   :  { %v344_v60 = vadd.f32 %v343_v59, %v333_v50 }
 0x312   :  { %v613_v45 = vpop.permute.xlu0 %612 }
 0x313   :  { %805 = vmatmul.mubr.msk.f32.vlgmr.msra.gmra.mxu1 %vm352_vm2, %v344_v60 }
 0x314   :  { %808 = vmatpush3.msra.mxu1 %v442_v61  ;;  %839 = vmatprep.mubr.msk.f32.mxu1 %vm1005_vm0, %v1004_v0 }
 0x315   :  { %809 = vmatprep.subr.mxu1 %v1004_v0 }
 0x316   :  { %810 = vmatpush3.msra.mxu1 %v441_v62 }
 0x317   :  { %811 = vmatprep.subr.mxu1 %v1004_v0 }
 0x318   :  { %812 = vmatpush3.msra.mxu1 %v440_v63 }
 0x319   :  { %813 = vmatprep.subr.mxu1 %v1004_v0 }
 0x31a   :  { %814 = vmatpush3.msra.mxu1 %v439_v1 }
 0x31b   :  { %815 = vmatprep.subr.mxu1 %v1004_v0 }
 0x31c   :  { %816 = vmatpush3.msra.mxu1 %v438_v2 }
 0x31d   :  { %817 = vmatprep.subr.mxu1 %v1004_v0 }
 0x31e   :  { %818 = vmatpush3.msra.mxu1 %v437_v3 }
 0x31f   :  { %819 = vmatprep.subr.mxu1 %v1004_v0 }
 0x320   :  { %820 = vmatpush3.msra.mxu1 %v436_v4 }
 0x321   :  { %821 = vmatprep.subr.mxu1 %v1004_v0 }
 0x322   :  { %822 = vmatpush3.msra.mxu1 %v435_v5 }
 0x323   :  { %823 = vmatprep.subr.mxu1 %v1004_v0 }
 0x324   :  { %824 = vmatpush3.msra.mxu1 %v434_v6 }
 0x325   :  { %825 = vmatprep.subr.mxu1 %v1004_v0 }
 0x326   :  { %826 = vmatpush3.msra.mxu1 %v433_v7 }
 0x327   :  { %827 = vmatprep.subr.mxu1 %v1004_v0 }
 0x328   :  { %828 = vmatpush3.msra.mxu1 %v432_v8 }
 0x329   :  { %829 = vmatprep.subr.mxu1 %v1004_v0 }
 0x32a   :  { %830 = vmatpush3.msra.mxu1 %v431_v9 }
 0x32b   :  { %831 = vmatprep.subr.mxu1 %v1004_v0 }
 0x32c   :  { %832 = vmatpush3.msra.mxu1 %v430_v10 }
 0x32d   :  { %833 = vmatprep.subr.mxu1 %v1004_v0 }
 0x32e   :  { %834 = vmatpush3.msra.mxu1 %v429_v11 }
 0x32f   :  { %835 = vmatprep.subr.mxu1 %v1004_v0 }
 0x330   :  { %836 = vmatpush3.msra.mxu1 %v428_v12 }
 0x331   :  { %837 = vmatprep.subr.mxu1 %v1004_v0 }
 0x332   :  { %838 = vmatpush3.msra.mxu1 %v427_v13 }
 0x3d3   :  { %v422_v28 = vpop.f32.mrf.mxu1 }
 0x3d4   :  { %v423_v29 = vadd.f32 %v639_v27, %v422_v28 }
 0x3d5   :  { %v806_v30 = vpop.f32.mrf.mxu1 }
 0x3d6   :  { %v426_v31 = vmax.f32 %v423_v29, 0.0 }
 0x3d8   :  { %840 = vmatmul.mubr.f32.vlgmr.msra.gmra.mxu1 %v426_v31 }
 0x498   :  { %v514_v36 = vpop.f32.mrf.mxu1 }
 0x499   :  { %v515_v37 = vadd.f32 %v641_v35, %v514_v36 }
 0x49a   :  { %v841_v38 = vpop.f32.mrf.mxu1 }
 0x49b   :  { %v518_v39 = vmax.f32 %v515_v37, 0.0 }
 0x49d   :  { %875 = vmatmul.mubr.f32.vlgmr.msra.gmra.mxu0 %v518_v39 }
 0x55d   :  { %v606_v41 = vpop.f32.mrf.mxu0 }
 0x55e   :  { %v607_v42 = vadd.f32 %v642_v40, %v606_v41 }
 0x55f   :  { %v876_v43 = vpop.f32.mrf.mxu0 }
 0x560   :  { %v610_v44 = vmax.f32 %v607_v42, 0.0 }
 0x562   :  { %v615_v0 = vsel %vm78_vm1, %v610_v44, %v613_v45 }
 0x563   :  { %617 = vst.msk [vmem:[#allocation10] sm:$0xff] %vm616_vm3, %v615_v0 }
 0x564   :  { %981 = shalt.err (!%p978_p10)
}
 0x565   :  { %627 = dma.vmem_to_hbm [thread:$0]  %s625_s10, 128, %s1137_s4, [#allocation4]  }
 0x566   :  { %996 = dma.done.wait [#allocation4], 128  }
 0x567   :  { %997 = vsyncadd [#allocation4], 4294967168 }
 0x568   :  { %631 = vsyncpa [#allocation3], 1 }
 0x569   :  { %632 = vsyncpa [#allocation6], 1 }
 0x56a   :  { %633 = vsyncpa [#allocation9], 1 }
 0x56b   :  { %634 = vsyncpa [#allocation4], 1 }

</bundles_post_ra>
